<compile_context>
chip_gen: v5e
topology: v5e:2x2
jax: 0.10.0
libtpu: 0.0.40
codegen_flags: <defaults>
</compile_context>

<pallas_src>
import functools

import jax
import jax.numpy as jnp
from jax.experimental import pallas as pl
from jax.experimental.pallas import tpu as pltpu


def _rmsnorm_kernel(x_ref, w_ref, o_ref, *, eps):
    # x_ref: (tile_rows, hidden) in input dtype; w_ref: (1, hidden)
    x_f32 = x_ref[...].astype(jnp.float32)
    var = jnp.mean(x_f32 * x_f32, axis=-1, keepdims=True)      # f32, per row
    inv = jax.lax.rsqrt(var + eps)                              # EUP rsqrt
    normed = x_f32 * inv                                        # f32 (torch promotion)
    out = w_ref[...].astype(jnp.float32) * normed               # weight * hs, f32
    o_ref[...] = out.astype(o_ref.dtype)                        # single .to(input_dtype)


def _round_up(x, m):
    return ((x + m - 1) // m) * m


def _vmem_capacity_bytes():
    """Physical VMEM per TensorCore (generation-aware), conservative fallback."""
    try:
        info = pltpu.get_tpu_info()
        cap = getattr(info, "vmem_capacity_bytes", None)
        if cap:
            return int(cap)
    except Exception:
        pass
    return 64 << 20  # assume v7x (smallest VMEM/TC) when unknown


def _pick_tile_rows(rows, hidden, dtype_bytes, vmem_capacity,
                    max_tile_rows=4096, min_grid_steps=8):
    """Pick a roofline-friendly row tile.

    - multiple of the sublane pack (8 for 4-byte, 16 for 2-byte, 32 for 1-byte)
    - ~8 MiB blocks on 128 MiB-VMEM chips, ~4 MiB on 64 MiB-VMEM chips
    - never larger than the (packed-up) row count
    - shrink until >= min_grid_steps grid steps when possible, so both v7x TCs
      get several blocks and intra-core double-buffering can overlap DMA.
    """
    pack = 8 * max(1, 4 // max(1, dtype_bytes))
    row_bytes = max(1, hidden * dtype_bytes)
    target_block_bytes = (8 << 20) if vmem_capacity >= (96 << 20) else (4 << 20)

    tr = max(pack, target_block_bytes // row_bytes)
    tr = min(tr, max_tile_rows)
    tr = max(pack, (tr // pack) * pack)
    tr = min(tr, _round_up(rows, pack))

    while tr > pack and pl.cdiv(rows, tr) < min_grid_steps:
        nxt = max(pack, ((tr // 2) // pack) * pack)
        if nxt == tr:
            break
        tr = nxt
    return tr


def llmc_llama_rmsnorm(hidden_states, weight, eps=1e-6, tile_rows=None):
    """Pallas TPU RMSNorm matching LlmcLlamaRMSNorm.forward (bias is None)."""
    input_dtype = hidden_states.dtype
    orig_shape = hidden_states.shape
    hidden = orig_shape[-1]
    x2d = hidden_states.reshape(-1, hidden)
    rows = x2d.shape[0]
    dtype_bytes = jnp.dtype(input_dtype).itemsize
    w_bytes = jnp.dtype(weight.dtype).itemsize

    vmem_capacity = _vmem_capacity_bytes()
    if tile_rows is None:
        tile_rows = _pick_tile_rows(rows, hidden, dtype_bytes, vmem_capacity)

    # Ragged grid: no host-side padding, boundary block stores are masked.
    grid = (pl.cdiv(rows, tile_rows),)

    # VMEM budget: double-buffered in + out blocks, the f32 promoted block and a
    # f32 product temp, resident weight, plus slack. Cap at 75% of physical VMEM.
    block_bytes = tile_rows * hidden * dtype_bytes
    f32_block = tile_rows * hidden * 4
    vmem_limit = 4 * block_bytes + 2 * f32_block + 2 * hidden * w_bytes + (2 << 20)
    vmem_limit = max(vmem_limit, 32 << 20)
    vmem_limit = min(vmem_limit, int(0.75 * vmem_capacity))

    cost = pl.CostEstimate(
        flops=4 * rows * hidden,
        transcendentals=rows,
        bytes_accessed=2 * rows * hidden * dtype_bytes + hidden * w_bytes,
    )

    w2d = weight.reshape(1, hidden)

    out = pl.pallas_call(
        functools.partial(_rmsnorm_kernel, eps=eps),
        out_shape=jax.ShapeDtypeStruct((rows, hidden), input_dtype),
        grid_spec=pltpu.PrefetchScalarGridSpec(
            num_scalar_prefetch=0,
            grid=grid,
            in_specs=[
                pl.BlockSpec((tile_rows, hidden), lambda i: (i, 0)),
                pl.BlockSpec((1, hidden), lambda i: (0, 0)),
            ],
            out_specs=pl.BlockSpec((tile_rows, hidden), lambda i: (i, 0)),
        ),
        compiler_params=pltpu.CompilerParams(
            dimension_semantics=("parallel",),
            vmem_limit_bytes=int(vmem_limit),
        ),
        cost_estimate=cost,
    )(x2d, w2d)

    return out.reshape(orig_shape)


def rmsnorm_ref(x, w, eps=1e-6):
    # Faithful to the PyTorch module: variance in f32, multiplies promote to
    # f32, single cast back to input dtype at the end.
    x_f32 = x.astype(jnp.float32)
    var = jnp.mean(x_f32 * x_f32, axis=-1, keepdims=True)
    normed = x_f32 * jax.lax.rsqrt(var + eps)
    return (w.astype(jnp.float32) * normed).astype(x.dtype)


if __name__ == "__main__":
    key = jax.random.PRNGKey(0)
    kx, kw, kx2 = jax.random.split(key, 3)

    # bf16 case with rows (batch*seq = 18) NOT a multiple of the tile ->
    # exercises the ragged boundary block (masked stores) and a 2-step grid.
    batch, seq, hidden = 2, 9, 256
    x = jax.random.normal(kx, (batch, seq, hidden), dtype=jnp.float32).astype(jnp.bfloat16)
    weight = (jnp.ones((hidden,), dtype=jnp.float32)
              + 0.01 * jax.random.normal(kw, (hidden,), dtype=jnp.float32)).astype(jnp.bfloat16)

    out = llmc_llama_rmsnorm(x, weight, eps=1e-6)
    jax.block_until_ready(out)
    ref = rmsnorm_ref(x, weight, eps=1e-6)
    assert out.shape == x.shape and out.dtype == x.dtype
    err = jnp.max(jnp.abs(out.astype(jnp.float32) - ref.astype(jnp.float32)))
    assert err <= 2e-2, f"bf16 mismatch vs reference: {err}"

    # f32 sanity check at another small shape (rows divisible by the pack).
    x32 = jax.random.normal(kx2, (2, 8, 128), dtype=jnp.float32)
    w32 = jnp.ones((128,), dtype=jnp.float32)
    out32 = llmc_llama_rmsnorm(x32, w32, eps=1e-6)
    jax.block_until_ready(out32)
    ref32 = rmsnorm_ref(x32, w32, eps=1e-6)
    err32 = jnp.max(jnp.abs(out32 - ref32))
    assert err32 <= 1e-5, f"f32 mismatch vs reference: {err32}"

    print("KERNEL_OK")
</pallas_src>

<mosaic_0001>
module attributes {stable_mosaic.version = 11 : i64} {
  func.func @_rmsnorm_kernel(%arg0: i32, %arg1: memref<16x256xbf16, #tpu.memory_space<vmem>>, %arg2: memref<1x256xbf16, #tpu.memory_space<vmem>>, %arg3: memref<16x256xbf16, #tpu.memory_space<vmem>>) attributes {dimension_semantics = [#tpu.dimension_semantics<parallel>], iteration_bounds = array<i64: 2>, scalar_prefetch = 0 : i64, scratch_operands = 0 : i64, tpu.core_type = #tpu.core_type<tc>, window_params = [{transform_indices = @transform_0, window_bounds = array<i64: 16, 256>}, {pipeline_mode = #tpu.pipeline_mode<synchronous>, transform_indices = @transform_1, window_bounds = array<i64: 1, 256>}, {transform_indices = @transform_2, window_bounds = array<i64: 16, 256>}]} {
    %c0 = arith.constant 0 : index
    %c0_0 = arith.constant 0 : index
    %0 = vector.load %arg1[%c0, %c0_0] : memref<16x256xbf16, #tpu.memory_space<vmem>>, vector<16x256xbf16>
    %1 = arith.extf %0 : vector<16x256xbf16> to vector<16x256xf32>
    %2 = arith.mulf %1, %1 : vector<16x256xf32>
    %cst = arith.constant dense<0.000000e+00> : vector<16xf32>
    %3 = vector.multi_reduction <add>, %2, %cst [1] : vector<16x256xf32> to vector<16xf32>
    %4 = vector.shape_cast %3 : vector<16xf32> to vector<16x1xf32>
    %cst_1 = arith.constant 2.560000e+02 : f32
    %5 = vector.broadcast %cst_1 : f32 to vector<16x1xf32>
    %6 = arith.divf %4, %5 : vector<16x1xf32>
    %cst_2 = arith.constant 9.99999997E-7 : f32
    %7 = vector.broadcast %cst_2 : f32 to vector<16x1xf32>
    %8 = arith.addf %6, %7 : vector<16x1xf32>
    %9 = math.rsqrt %8 : vector<16x1xf32>
    %10 = vector.broadcast %9 : vector<16x1xf32> to vector<16x256xf32>
    %11 = arith.mulf %1, %10 : vector<16x256xf32>
    %c0_3 = arith.constant 0 : index
    %c0_4 = arith.constant 0 : index
    %12 = vector.load %arg2[%c0_3, %c0_4] : memref<1x256xbf16, #tpu.memory_space<vmem>>, vector<1x256xbf16>
    %13 = arith.extf %12 : vector<1x256xbf16> to vector<1x256xf32>
    %14 = vector.broadcast %13 : vector<1x256xf32> to vector<16x256xf32>
    %15 = arith.mulf %14, %11 : vector<16x256xf32>
    %16 = arith.truncf %15 : vector<16x256xf32> to vector<16x256xbf16>
    %c0_5 = arith.constant 0 : index
    %c0_6 = arith.constant 0 : index
    %17 = vector.load %arg3[%c0_5, %c0_6] : memref<16x256xbf16, #tpu.memory_space<vmem>>, vector<16x256xbf16>
    tpu.vector_store %arg3[%c0_5, %c0_6], %16 {strides = array<i32>} : memref<16x256xbf16, #tpu.memory_space<vmem>>, vector<16x256xbf16>,
    return
  }
  func.func @transform_0(%arg0: i32) -> (i32, i32) {
    %c0_i32 = arith.constant 0 : i32
    %c0_i32_0 = arith.constant 0 : i32
    return %arg0, %c0_i32 : i32, i32
  }
  func.func @transform_1(%arg0: i32) -> (i32, i32) {
    %c0_i32 = arith.constant 0 : i32
    %c0_i32_0 = arith.constant 0 : i32
    %c0_i32_1 = arith.constant 0 : i32
    return %c0_i32, %c0_i32_0 : i32, i32
  }
  func.func @transform_2(%arg0: i32) -> (i32, i32) {
    %c0_i32 = arith.constant 0 : i32
    %c0_i32_0 = arith.constant 0 : i32
    return %arg0, %c0_i32 : i32, i32
  }
}

</mosaic_0001>

<bundles_post_ra>
// kernel: tpu_custom_call.1
= control target key start
LH: loop header
LB: loop body
LE: loop exit
PB: predicated region body
PF: predicated region fallthrough
CT: control target
= control target key end

     0   :  { %7 = vsyncpa [#allocation3], 0  ;;  %s848_s0 = inlined_call_operand.hbm [shape: bf16[18,256], index: 0, kind: input, shape index: {}]   ;;  %s849_s1 = inlined_call_operand.hbm [shape: bf16[1,256], index: 1, kind: input, shape index: {}]   ;;  %s850_s2 = inlined_call_operand.hbm [shape: bf16[18,256], index: 2, kind: output, shape index: {}]  }
   0x1   :  { %9 = vsyncpa [#allocation3 + $0x1], 0 }
   0x2   :  { %10 = vsyncpa [#allocation6], 0 }
   0x3   :  { %11 = vsyncpa [#allocation4], 0 }
   0x4   :  { %13 = vsyncpa [#allocation4 + $0x1], 0  ;;  %s646_s9 = smov 0   ;;  %s648_s10 = smov 0  }
   0x5   :  { %s650_s11 = smov 0   ;;  %s652_s12 = smov 0  }
   0x6 LB: > { %s667_s13 = sadd.s32 4294967295, %s621_s12   ;;  %s376_s14 = sadd.s32 4294967294, %s621_s12   ;;  %s621_s12 = sphi %s652_s12, %s867_s12   ;;  %s617_s11 = sphi %s650_s11, %s866_s11   ;;  %s613_s10 = sphi %s648_s10, %s865_s10   ;;  %s609_s9 = sphi %s646_s9, %s864_s9  }
   0x7   : > { %s671_s15 = sadd.s32 1, %s621_s12   ;;  %s26_s16 = sadd.s32 1, %s617_s11 }
   0x8   : > { %s23_s17 = ssub.s32 %s621_s12, %s671_s15  ;;  %p33_p0 = scmp.ne.s32.totalorder %s617_s11, %s613_s10 }
   0x9   : > { %p24_p1 = scmp.eq.s32.totalorder %s23_s17, 0  ;;  %p34_p2 = scmp.eq.s32.totalorder %s621_s12, 0 }
   0xa   : > { %p39_p3 = scmp.ne.s32.totalorder %s613_s10, %s609_s9  ;;  %p852_p4 = scmp.eq.s32.totalorder %s667_s13, 0 }
   0xb   : > { %s683_s18 = scalar_select %p24_p1, %s617_s11, %s26_s16  }
   0xc   : > { %p685_p5 = por %p34_p2, %p33_p0  ;;  %p691_p6 = por %p852_p4, %p39_p3 }
   0xd   : > { %p84_p7 = scmp.eq.s32.totalorder %s667_s13, 1  ;;  %p90_p8 = scmp.eq.s32.totalorder %s376_s14, 1 }
   0xe   : > { %p377_p9 = scmp.ge.s32.totalorder %s621_s12, 1  ;;  %p97_p10 = scmp.lt.s32.totalorder %s621_s12, 3 }
   0xf   : > { %p698_p11 = por %p84_p7, %p33_p0  ;;  %p702_p12 = por %p90_p8, %p39_p3 }
  0x10   : > { %p706_p13 = pnand %p377_p9, %p97_p10  ;;  %s109_s26 = sshll.u32 %s849_s1, 4  ;;  %s110_s26 = int_to_ptr.hbm [resolvable:$true] %s109_s26 }
  0x11   : > { %s856_s22 = scalar_select %p702_p12, 1, 0 }
  0x12   : > { %p416_p1 = pneg %p706_p13  ;;  %s623_s27 = smov [#allocation5]  }
  0x13   : > { %s111_s28 = sshll.u32 %s623_s27, 4  ;;  %p851_p2 = scmp.ge.s32.totalorder %s621_s12, 2  ;;  %s112_s28 = int_to_ptr.vmem [resolvable:$true] %s111_s28 }
  0x14   : > { %p417_p0 = pnand %p416_p1, %p852_p4 }
  0x15   : > { %118 = sbr.rel (%p851_p2) target bundleno = 62 (0x3e), region = 20 }
  0x16   : > { %419 = dma.hbm_to_vmem [thread:$0]  (!%p417_p0), %s110_s26, 32, %s112_s28, [#allocation6]  }
  0x1a   : > { %121 = sbr.rel (!%p685_p5) target bundleno = 62 (0x3e), region = 24  ;;  %s122_s29 = sand.u32 (%p685_p5), 1, %s617_s11  }
  0x1b   : > { %s381_s30 = sshll.u32 (%p685_p5), %s621_s12, 1  ;;  %s380_s3 = sshll.u32 (%p685_p5), %s122_s29, 4 }
  0x1c   : > { %s128_s4 = ssub.s32 (%p685_p5), 3, %s381_s30  ;;  %s727_s8 = scalar_lea.sflag (%p685_p5), [#allocation3], %s122_s29 }
  0x1d   : > { %p129_p3 = scmp.lt.s32.totalorder (%p685_p5), %s128_s4, 2  ;;  %s126_s14 = scalar_lea.vmem (%p685_p5), [#allocation2], %s380_s3 }
  0x1f   : > { %s869_s4 = smov (!%p129_p3, %s128_s4), 2 }
  0x20   : > { %s404_s5 = sshll.u32 %s869_s4, 3 }
  0x21   : > { %s133_s6 = ssub.s32 16, %s404_s5 }
  0x22   : > { %s134_s7 = sshll.u32 %s133_s6, 4 }
  0x23   : > { %135 = vsyncadd %s727_s8, %s134_s7  ;;  %p730_p5 = scmp.ne.s32.totalorder %s404_s5, 0  ;;  %s406_s17 = sshll.u32 %s621_s12, 4 }
  0x24   : > { %s139_s25 = scalar_lea.hbm %s848_s0, %s406_s17  ;;  %s738_s26 = sshll.u32 %s126_s14, 4  ;;  %s144_s26 = int_to_ptr.vmem [resolvable:$true] %s738_s26 }
  0x25   : > { %s141_s27 = sshll.u32 %s139_s25, 4  ;;  %s388_s28 = sshll.u32 %s869_s4, 7  ;;  %s741_s27 = int_to_ptr.hbm [resolvable:$true] %s141_s27 }
  0x26   : > { %s501_s29 = sshra.s32 %s741_s27, 4  ;;  %s503_s30 = sshrl.u32 %s388_s28, 4  ;;  %s502_s29 = int_to_ptr.hbm [resolvable:$true] %s501_s29 }
  0x27   : > { %s508_s3 = scalar_lea.hbm %s502_s29, %s503_s30  ;;  %s512_s7 = scalar_lea.hbm %s848_s0, 24 }
  0x28   : > { %p509_p7 = scmp.ne.s32.totalorder %s502_s29, %s508_s3  ;;  %p513_p10 = scmp.lt.s32.totalorder %s502_s29, %s848_s0 }
  0x29   : > { %p514_p1 = scmp.lt.s32.totalorder %s512_s7, %s508_s3 }
  0x2a   : > { %p510_p8 = pnand %p509_p7, %p730_p5 }
  0x2b   : > { %p515_p0 = por %p514_p1, %p513_p10 }
  0x2c   : > { %p511_p9 = pneg %p510_p8 }
  0x2e   : > { %p516_p3 = pnand %p515_p0, %p511_p9 }
  0x30   : > { %519 = shalt.err (!%p516_p3)
}
  0x31   : > { %s520_s19 = sshra.s32 %s144_s26, 4  ;;  %s624_s25 = smov [#allocation2]   ;;  %s521_s19 = int_to_ptr.vmem [resolvable:$true] %s520_s19 }
  0x32   : > { %s527_s24 = scalar_lea.vmem %s521_s19, %s503_s30  ;;  %s531_s5 = scalar_lea.vmem %s624_s25, 32 }
  0x33   : > { %p528_p7 = scmp.ne.s32.totalorder %s521_s19, %s527_s24  ;;  %p533_p4 = scmp.lt.s32.totalorder %s531_s5, %s527_s24 }
  0x35   : > { %p529_p8 = pnand %p528_p7, %p730_p5 }
  0x37   : > { %p530_p2 = pneg %p529_p8 }
  0x39   : > { %p535_p12 = pnand %p533_p4, %p530_p2 }
  0x3b   : > { %538 = shalt.err (!%p535_p12)
}
  0x3c   : > { %s625_s29 = smov 128   ;;  %s626_s3 = smov 8  }
  0x3d   : > { %149 = dma.hbm_to_vmem [thread:$0]  (%p730_p5), %s741_s27, %s388_s28, %s144_s26, %s727_s8, %s625_s29, %s625_s29, %s626_s3  }
  0x3e PF: > { %155 = sbr.rel (%p706_p13) target bundleno = 262 (0x106), region = 28  ;;  %s770_s30 = sand.u32 (!%p706_p13), 1, %s613_s10  }
  0x3f   : > { %s390_s6 = sshll.u32 (!%p706_p13), %s770_s30, 4  ;;  %s158_s7 = scalar_lea.sflag (!%p706_p13), [#allocation3], %s770_s30 }
  0x40   : > { %s161_s14 = scalar_lea.vmem (!%p706_p13), [#allocation2], %s390_s6 }
  0x43   : > { %596 = dma.done.wait (%p691_p6), %s158_s7, 256  }
  0x44   : > { %598 = vsyncadd (%p691_p6), %s158_s7, 4294967040  ;;  %p859_p4 = scmp.eq.s32.totalorder %s667_s13, 0 }
  0x46   : > { %600 = dma.done.wait (%p859_p4), [#allocation6], 32   ;;  %p860_p12 = pmov %p859_p4 }
  0x47   : > { %v200_v0 = vld [vmem:[%s161_s14] sm:$0xff]  ;;  %v201_v1 = vld [vmem:[%s161_s14 + $0x8] sm:$0xff]  ;;  %v627_v12 = vmov 256.0   ;;  %s187_s20 = scalar_lea.vmem [#allocation7], %s390_s6  ;;  %s269_s23 = scalar_lea.sflag [#allocation4], %s770_s30 }
  0x48   : > { %602 = vsyncadd (%p860_p12), [#allocation6], 4294967264  ;;  %v202_v2 = vunpack.c.l.bf16 %v200_v0  ;;  %v203_v3 = vunpack.c.h.bf16 %v200_v0  ;;  %v204_v6 = vunpack.c.l.bf16 %v201_v1  ;;  %v205_v7 = vunpack.c.h.bf16 %v201_v1  ;;  %v251_v24 = vld [vmem:[#allocation5] sm:$0x3]  ;;  %s394_s4 = sshll.u32 (%p698_p11), %s667_s13, 1 }
  0x49   : > { %465 = vrcp.f32 %v627_v12  ;;  %v252_v28 = vunpack.c.l.bf16 %v251_v24  ;;  %s277_s8 = ssub.s32 (%p698_p11), 3, %s394_s4 }
  0x4a   : > { %v206_v4 = vmul.f32 %v202_v2, %v202_v2  ;;  %v207_v5 = vmul.f32 %v203_v3, %v203_v3  ;;  %v208_v9 = vmul.f32 %v204_v6, %v204_v6  ;;  %v209_v10 = vmul.f32 %v205_v7, %v205_v7  ;;  %p278_p6 = scmp.lt.s32.totalorder (%p698_p11), %s277_s8, 2 }
  0x4b   : > { %v254_v31 = vperm.slane %v252_v28, 0  ;;  %v255_v32 = vperm.slane %v252_v28, 2 }
  0x4c   : > { %v210_v8 = vadd.f32 %v207_v5, %v206_v4  ;;  %v213_v11 = vadd.f32 %v209_v10, %v208_v9 }
  0x4d   : > { %v258_v37 = vperm.slane %v254_v31, 0  ;;  %v259_v38 = vperm.slane %v255_v32, 0 }
  0x4e   : > { %211 = vadd.xlane.f32.xlu0 %v210_v8 }
  0x4f   : > { %v466_v13 = vpop.eup %465 }
  0x50   : > { %v217_v14 = vmul.f32 256.0, %v466_v13  ;;  %vm221_vm0 = vweird.f32 %v466_v13 }
  0x52   : > { %v218_v15 = vsub.f32 1.0, %v217_v14 }
  0x54   : > { %v219_v16 = vmul.f32 %v466_v13, %v218_v15 }
  0x56   : > { %214 = vadd.xlane.f32.xlu0 %v213_v11  ;;  %v220_v17 = vadd.f32 %v466_v13, %v219_v16 }
  0x58   : > { %v222_v18 = vsel %vm221_vm0, %v466_v13, %v220_v17 }
  0xc1   : > { %v212_v19 = vpop.xlane.xlu0 %211 }
  0xc2   : > { %v223_v20 = vmul.f32 %v222_v18, %v212_v19 }
  0xc4   : > { %v225_v21 = vadd.f32 1e-06, %v223_v20 }
  0xc6   : > { %467 = vrsqrt.f32 %v225_v21  ;;  %vm233_vm2 = vweird.f32 %v225_v21 }
  0xc9   : > { %v215_v22 = vpop.xlane.xlu0 %214 }
  0xca   : > { %v224_v23 = vmul.f32 %v222_v18, %v215_v22 }
  0xcc   : > { %v468_v25 = vpop.eup %467  ;;  %v226_v26 = vadd.f32 1e-06, %v224_v23 }
  0xcd   : > { %v228_v27 = vmul.f32 %v468_v25, %v225_v21  ;;  %vm234_vm1 = vweird.f32 %v468_v25 }
  0xce   : > { %469 = vrsqrt.f32 %v226_v26  ;;  %vm235_vm3 = vmor %vm233_vm2, %vm234_vm1  ;;  %vm243_vm5 = vweird.f32 %v226_v26 }
  0xcf   : > { %v229_v29 = vmul.f32 %v468_v25, %v228_v27 }
  0xd1   : > { %v230_v30 = vmul.f32 0.5, %v229_v29 }
  0xd3   : > { %v231_v33 = vsub.f32 1.5, %v230_v30 }
  0xd4   : > { %v470_v34 = vpop.eup %469 }
  0xd5   : > { %v232_v35 = vmul.f32 %v468_v25, %v231_v33  ;;  %v238_v36 = vmul.f32 %v470_v34, %v226_v26  ;;  %vm244_vm4 = vweird.f32 %v470_v34 }
  0xd6   : > { %vm245_vm6 = vmor %vm243_vm5, %vm244_vm4 }
  0xd7   : > { %v236_v39 = vsel %vm235_vm3, %v468_v25, %v232_v35  ;;  %v239_v40 = vmul.f32 %v470_v34, %v238_v36 }
  0xd8   : > { %v247_v41 = vmul.f32 %v236_v39, %v202_v2  ;;  %v248_v42 = vmul.f32 %v236_v39, %v203_v3 }
  0xd9   : > { %v240_v43 = vmul.f32 0.5, %v239_v40 }
  0xda   : > { %v260_v44 = vmul.f32 %v258_v37, %v247_v41  ;;  %v261_v45 = vmul.f32 %v259_v38, %v248_v42 }
  0xdb   : > { %v241_v46 = vsub.f32 1.5, %v240_v43 }
  0xdc   : > { %v264_v47 = vpack.c.bf16 %v261_v45, %v260_v44 }
  0xdd   : > { %v242_v48 = vmul.f32 %v470_v34, %v241_v46 }
  0xde   : > { %266 = vst [vmem:[%s187_s20] sm:$0xff] %v264_v47 }
  0xdf   : > { %v246_v49 = vsel %vm245_vm6, %v470_v34, %v242_v48 }
  0xe0   : > { %v249_v50 = vmul.f32 %v246_v49, %v204_v6  ;;  %v250_v51 = vmul.f32 %v246_v49, %v205_v7 }
  0xe2   : > { %v262_v52 = vmul.f32 %v258_v37, %v249_v50  ;;  %v263_v53 = vmul.f32 %v259_v38, %v250_v51  ;;  %275 = sbr.rel (!%p698_p11) target bundleno = 262 (0x106), region = 40 }
  0xe4   : > { %v265_v54 = vpack.c.bf16 %v263_v53, %v262_v52 }
  0xe6   : > { %267 = vst [vmem:[%s187_s20 + $0x8] sm:$0xff] %v265_v54 }
  0xe7   : > { %s871_s8 = smov (!%p278_p6, %s277_s8), 2 }
  0xe8   : > { %s407_s16 = sshll.u32 %s871_s8, 3 }
  0xe9   : > { %s282_s26 = ssub.s32 16, %s407_s16 }
  0xea   : > { %s283_s27 = sshll.u32 %s282_s26, 4 }
  0xeb   : > { %284 = vsyncadd %s269_s23, %s283_s27  ;;  %p795_p13 = scmp.ne.s32.totalorder %s407_s16, 0  ;;  %s409_s21 = sshll.u32 %s667_s13, 4 }
  0xec   : > { %s288_s24 = scalar_lea.hbm %s850_s2, %s409_s21  ;;  %s290_s25 = sshll.u32 %s187_s20, 4  ;;  %s803_s25 = int_to_ptr.vmem [resolvable:$true] %s290_s25 }
  0xed   : > { %s292_s5 = sshll.u32 %s288_s24, 4  ;;  %s401_s29 = sshll.u32 %s871_s8, 7  ;;  %s805_s5 = int_to_ptr.hbm [resolvable:$true] %s292_s5 }
  0xee   : > { %s540_s3 = sshra.s32 %s803_s25, 4  ;;  %s542_s6 = sshrl.u32 %s401_s29, 4  ;;  %s541_s3 = int_to_ptr.vmem [resolvable:$true] %s540_s3 }
  0xef   : > { %s547_s7 = scalar_lea.vmem %s541_s3, %s542_s6  ;;  %s628_s13 = smov [#allocation7]  }
  0xf0   : > { %p548_p11 = scmp.ne.s32.totalorder %s541_s3, %s547_s7  ;;  %s551_s14 = scalar_lea.vmem %s628_s13, 32 }
  0xf1   : > { %p553_p9 = scmp.lt.s32.totalorder %s551_s14, %s547_s7 }
  0xf2   : > { %p549_p2 = pnand %p548_p11, %p795_p13 }
  0xf4   : > { %p550_p5 = pneg %p549_p2 }
  0xf6   : > { %p555_p10 = pnand %p553_p9, %p550_p5 }
  0xf8   : > { %558 = shalt.err (!%p555_p10)
}
  0xf9   : > { %s559_s20 = sshra.s32 %s805_s5, 4  ;;  %s570_s27 = scalar_lea.hbm %s850_s2, 24  ;;  %s560_s20 = int_to_ptr.hbm [resolvable:$true] %s559_s20 }
  0xfa   : > { %s566_s4 = scalar_lea.hbm %s560_s20, %s542_s6  ;;  %p571_p7 = scmp.lt.s32.totalorder %s560_s20, %s850_s2 }
  0xfb   : > { %p567_p1 = scmp.ne.s32.totalorder %s560_s20, %s566_s4  ;;  %p572_p8 = scmp.lt.s32.totalorder %s570_s27, %s566_s4 }
  0xfd   : > { %p568_p0 = pnand %p567_p1, %p795_p13  ;;  %p573_p4 = por %p572_p8, %p571_p7 }
  0xff   : > { %p569_p3 = pneg %p568_p0 }
 0x101   : > { %p574_p12 = pnand %p573_p4, %p569_p3 }
 0x103   : > { %577 = shalt.err (!%p574_p12)
}
 0x104   : > { %s629_s19 = smov 128   ;;  %s630_s24 = smov 8  }
 0x105   : > { %298 = dma.vmem_to_hbm [thread:$0]  (%p795_p13), %s803_s25, %s401_s29, %s805_s5, %s269_s23, %s629_s19, %s629_s19, %s630_s24  }
 0x106 PF: > { %s307_s3 = sand.u32 1, %s609_s9   ;;  %p862_p6 = scmp.ne.s32.totalorder %s856_s22, 0 }
 0x107   : > { %p863_p11 = scmp.ge.s32.totalorder %s621_s12, 2  ;;  %s308_s6 = scalar_lea.sflag [#allocation4], %s307_s3 }
 0x109   : > { %p421_p2 = pnand %p863_p11, %p862_p6 }
 0x10b   : > { %p422_p5 = pneg %p421_p2 }
 0x10d   : > { %604 = dma.done.wait (%p422_p5), %s308_s6, 256  }
 0x10e   : > { %606 = vsyncadd (%p422_p5), %s308_s6, 4294967040  ;;  %p16_p9 = scmp.ge.s32.totalorder %s671_s15, 4   ;;  %s864_s9 = smov %s613_s10 }
 0x10f   : > { %s865_s10 = smov %s617_s11  ;;  %s866_s11 = smov %s683_s18 }
 0x110   : > { %s867_s12 = smov %s671_s15  ;;  %18 = sbr.rel (!%p16_p9) target bundleno = 6 (0x6), region = 77 }
 0x115   :  { %314 = vsyncpa [#allocation3], 1 }
 0x116   :  { %316 = vsyncpa [#allocation3 + $0x1], 1 }
 0x117   :  { %317 = vsyncpa [#allocation6], 1 }
 0x118   :  { %318 = vsyncpa [#allocation4], 1 }
 0x119   :  { %320 = vsyncpa [#allocation4 + $0x1], 1 }

</bundles_post_ra>
